<compile_context>
chip_gen: v7x
topology: tpu7x:2x2x1
jax: 0.10.0
libtpu: 0.0.40
codegen_flags: <defaults>
</compile_context>

<pallas_src>
import math

import jax
import jax.numpy as jnp
from jax.experimental import pallas as pl
from jax.experimental.pallas import tpu as pltpu


def globel_state_kernel(
    h_ref, c_ref, g_ref, cg_ref,
    whh_t_ref,            # (H, H)   bf16  = W_hh.T
    wg_cat_ref,           # (H, 3H)  bf16  = [W_gh.T | W_gc.T | W_go.T]
    wbar_cat_ref,         # (H, 2H)  bf16  = [W_hc.T | W_ho.T]
    bh_ref,               # (1, H)   f32
    bgo_ref,              # (1, 2H)  f32   = [b_g | b_o]
    g_out_ref,            # (TB, H)  g_final
    cg_out_ref,           # (TB, H)  c_g_new
):
    h = h_ref[...].astype(jnp.float32)      # (N, TB, H)
    c = c_ref[...].astype(jnp.float32)      # (N, TB, H)
    g = g_ref[...].astype(jnp.float32)      # (TB, H)
    cg = cg_ref[...].astype(jnp.float32)    # (TB, H)

    n, tb, hdim = h.shape

    # --- fused g projections: one (TB,H)@(H,3H) bf16 matmul, f32 accumulate --
    g_proj = jnp.dot(g.astype(jnp.bfloat16), wg_cat_ref[...],
                     preferred_element_type=jnp.float32)        # (TB, 3H)
    gh = g_proj[:, :hdim]                                       # g @ W_gh.T

    # --- g_bar = mean over the list of h tensors ------------------------------
    g_bar = jnp.sum(h, axis=0) * (1.0 / n)                      # (TB, H)

    # --- fused g_bar projections: one (TB,H)@(H,2H) bf16 matmul --------------
    gbar_proj = jnp.dot(g_bar.astype(jnp.bfloat16), wbar_cat_ref[...],
                        preferred_element_type=jnp.float32)     # (TB, 2H)

    # --- f_j = sum_i sigmoid(h_i @ W_hh.T + b_h + g @ W_gh.T) * c_i ----------
    # fold bias + gh once -> a single broadcast add into the (N,TB,H) gate
    bias_h_plus_gh = gh + bh_ref[...]                           # (TB, H)

    h_flat = h.astype(jnp.bfloat16).reshape(n * tb, hdim)       # TB mult of 8
    hW = jnp.dot(h_flat, whh_t_ref[...],
                 preferred_element_type=jnp.float32).reshape(n, tb, hdim)
    gate = jax.nn.sigmoid(hW + bias_h_plus_gh[None, :, :])
    f_j = jnp.sum(gate * c, axis=0)                             # (TB, H)

    # --- f_g / o_g computed together on a lane-dense (TB, 2H) slab -----------
    gates2 = jax.nn.sigmoid(gbar_proj + g_proj[:, hdim:] + bgo_ref[...])
    f_g = gates2[:, :hdim]
    o_g = gates2[:, hdim:]

    cg_new = f_j + f_g * cg

    # two lane-dense direct stores (no concatenate, no wrapper-side split)
    cg_out_ref[...] = cg_new.astype(cg_out_ref.dtype)
    g_out_ref[...] = (o_g * jnp.tanh(cg_new)).astype(g_out_ref.dtype)


def prepare_globel_state_params(params):
    """Called ONCE (e.g. at init): pre-transpose / pre-concatenate weights and
    pre-cast the MXU operands to bf16 so no per-call work hits XLA/HBM."""
    H = params["W_hh"].shape[0]
    return {
        "whh_t": params["W_hh"].T.astype(jnp.bfloat16),              # (H, H)
        "wg_cat": jnp.concatenate(
            [params["W_gh"].T, params["W_gc"].T, params["W_go"].T],
            axis=1).astype(jnp.bfloat16),                            # (H, 3H)
        "wbar_cat": jnp.concatenate(
            [params["W_hc"].T, params["W_ho"].T],
            axis=1).astype(jnp.bfloat16),                            # (H, 2H)
        "bh": params["b_h"].reshape(1, H).astype(jnp.float32),       # (1, H)
        "bgo": jnp.concatenate(
            [params["b_g"], params["b_o"]]).reshape(1, 2 * H)
            .astype(jnp.float32),                                    # (1, 2H)
    }


def globel_state_forward(h_stack, c_stack, g, c_g, prepped, *, tb=8):
    """Forward pass.  `prepped` comes from prepare_globel_state_params.
    Returns (g_final, c_g_new) matching Globel_state.forward semantics."""
    N, B, H = h_stack.shape
    assert B % tb == 0 and tb % 8 == 0, "batch tile must divide B, mult of 8"
    assert H % 128 == 0, "hidden dim should be a multiple of 128 (lane axis)"

    grid = (B // tb,)

    # advisory cost hint for XLA scheduling around the custom call
    flops = 2 * N * B * H * H + 2 * B * H * (5 * H)
    transcendentals = N * B * H + 3 * B * H
    bytes_accessed = ((2 * N * B * H + 4 * B * H) * 4        # h,c,g,c_g,outs f32
                      + 6 * H * H * 2 + 3 * H * 4)           # bf16 weights, biases

    kernel = pl.pallas_call(
        globel_state_kernel,
        out_shape=(jax.ShapeDtypeStruct((B, H), jnp.float32),
                   jax.ShapeDtypeStruct((B, H), jnp.float32)),
        grid_spec=pltpu.PrefetchScalarGridSpec(
            num_scalar_prefetch=0,
            grid=grid,
            in_specs=[
                pl.BlockSpec((N, tb, H), lambda i: (0, i, 0)),   # h_stack
                pl.BlockSpec((N, tb, H), lambda i: (0, i, 0)),   # c_stack
                pl.BlockSpec((tb, H), lambda i: (i, 0)),         # g
                pl.BlockSpec((tb, H), lambda i: (i, 0)),         # c_g
                pl.BlockSpec((H, H), lambda i: (0, 0)),          # W_hh.T
                pl.BlockSpec((H, 3 * H), lambda i: (0, 0)),      # [gh|gc|go].T
                pl.BlockSpec((H, 2 * H), lambda i: (0, 0)),      # [hc|ho].T
                pl.BlockSpec((1, H), lambda i: (0, 0)),          # b_h
                pl.BlockSpec((1, 2 * H), lambda i: (0, 0)),      # [b_g|b_o]
            ],
            out_specs=[
                pl.BlockSpec((tb, H), lambda i: (i, 0)),         # g_final
                pl.BlockSpec((tb, H), lambda i: (i, 0)),         # c_g_new
            ],
        ),
        compiler_params=pltpu.CompilerParams(
            dimension_semantics=("parallel",),
            vmem_limit_bytes=64 * 1024 * 1024,
        ),
        cost_estimate=pl.CostEstimate(
            flops=flops,
            transcendentals=transcendentals,
            bytes_accessed=bytes_accessed),
    )

    g_final, c_g_new = kernel(
        h_stack, c_stack, g, c_g,
        prepped["whh_t"], prepped["wg_cat"], prepped["wbar_cat"],
        prepped["bh"], prepped["bgo"])
    return g_final, c_g_new


def _reference(h_stack, c_stack, g, c_g, params):
    """Pure-JAX f32 reference mirroring the PyTorch forward exactly."""
    def linear(x, W, b=None):
        y = x @ W.T
        return y if b is None else y + b

    N = h_stack.shape[0]
    g_bar = jnp.zeros_like(h_stack[0])
    for i in range(N):
        g_bar = g_bar + h_stack[i] / N
    f_j = jnp.zeros_like(h_stack[0])
    for i in range(N):
        f_j = f_j + jax.nn.sigmoid(
            linear(h_stack[i], params["W_hh"], params["b_h"])
            + linear(g, params["W_gh"])
        ) * c_stack[i]
    f_g = jax.nn.sigmoid(linear(g_bar, params["W_hc"], params["b_g"])
                         + linear(g, params["W_gc"]))
    o_g = jax.nn.sigmoid(linear(g_bar, params["W_ho"], params["b_o"])
                         + linear(g, params["W_go"]))
    c_g_new = f_j + f_g * c_g
    return o_g * jnp.tanh(c_g_new), c_g_new


if __name__ == "__main__":
    # list length N, batch B (multiple of the 8-row batch tile),
    # hidden H (multiple of 128 so every vreg / store is lane-dense)
    N, B, H = 4, 16, 128

    key = jax.random.PRNGKey(0)
    keys = jax.random.split(key, 16)

    stdv = 1.0 / math.sqrt(H)   # matches reset_parameters()
    params = {
        "W_hh": jax.random.uniform(keys[0], (H, H), jnp.float32, -stdv, stdv),
        "W_gh": jax.random.uniform(keys[1], (H, H), jnp.float32, -stdv, stdv),
        "b_h":  jax.random.uniform(keys[2], (H,),   jnp.float32, -stdv, stdv),
        "W_hc": jax.random.uniform(keys[3], (H, H), jnp.float32, -stdv, stdv),
        "W_gc": jax.random.uniform(keys[4], (H, H), jnp.float32, -stdv, stdv),
        "b_g":  jax.random.uniform(keys[5], (H,),   jnp.float32, -stdv, stdv),
        "W_ho": jax.random.uniform(keys[6], (H, H), jnp.float32, -stdv, stdv),
        "W_go": jax.random.uniform(keys[7], (H, H), jnp.float32, -stdv, stdv),
        "b_o":  jax.random.uniform(keys[8], (H,),   jnp.float32, -stdv, stdv),
    }

    h_stack = jax.random.normal(keys[9],  (N, B, H), jnp.float32)
    c_stack = jax.random.normal(keys[10], (N, B, H), jnp.float32)
    g       = jax.random.normal(keys[11], (B, H),    jnp.float32)
    c_g     = jax.random.normal(keys[12], (B, H),    jnp.float32)

    # one-time weight preparation (transposes + concatenations + bf16 cast)
    prepped = jax.tree_util.tree_map(
        jax.block_until_ready, prepare_globel_state_params(params))

    g_final, c_g_new = globel_state_forward(h_stack, c_stack, g, c_g, prepped)
    jax.block_until_ready((g_final, c_g_new))

    g_ref, cg_ref = _reference(h_stack, c_stack, g, c_g, params)
    # bf16 MXU operands with f32 accumulation -> relaxed tolerance vs f32 ref
    assert jnp.allclose(g_final, g_ref, atol=2e-2, rtol=2e-2)
    assert jnp.allclose(c_g_new, cg_ref, atol=2e-2, rtol=2e-2)

    print("KERNEL_OK")
</pallas_src>

<mosaic_0001>
module attributes {stable_mosaic.version = 11 : i64} {
  func.func @globel_state_kernel(%arg0: i32, %arg1: memref<4x8x128xf32, #tpu.memory_space<vmem>>, %arg2: memref<4x8x128xf32, #tpu.memory_space<vmem>>, %arg3: memref<8x128xf32, #tpu.memory_space<vmem>>, %arg4: memref<8x128xf32, #tpu.memory_space<vmem>>, %arg5: memref<128x128xbf16, #tpu.memory_space<vmem>>, %arg6: memref<128x384xbf16, #tpu.memory_space<vmem>>, %arg7: memref<128x256xbf16, #tpu.memory_space<vmem>>, %arg8: memref<1x128xf32, #tpu.memory_space<vmem>>, %arg9: memref<1x256xf32, #tpu.memory_space<vmem>>, %arg10: memref<8x128xf32, #tpu.memory_space<vmem>>, %arg11: memref<8x128xf32, #tpu.memory_space<vmem>>) attributes {dimension_semantics = [#tpu.dimension_semantics<parallel>], iteration_bounds = array<i64: 2>, scalar_prefetch = 0 : i64, scratch_operands = 0 : i64, tpu.core_type = #tpu.core_type<tc>, window_params = [{transform_indices = @transform_0, window_bounds = array<i64: 4, 8, 128>}, {transform_indices = @transform_1, window_bounds = array<i64: 4, 8, 128>}, {transform_indices = @transform_2, window_bounds = array<i64: 8, 128>}, {transform_indices = @transform_3, window_bounds = array<i64: 8, 128>}, {pipeline_mode = #tpu.pipeline_mode<synchronous>, transform_indices = @transform_4, window_bounds = array<i64: 128, 128>}, {pipeline_mode = #tpu.pipeline_mode<synchronous>, transform_indices = @transform_5, window_bounds = array<i64: 128, 384>}, {pipeline_mode = #tpu.pipeline_mode<synchronous>, transform_indices = @transform_6, window_bounds = array<i64: 128, 256>}, {pipeline_mode = #tpu.pipeline_mode<synchronous>, transform_indices = @transform_7, window_bounds = array<i64: 1, 128>}, {pipeline_mode = #tpu.pipeline_mode<synchronous>, transform_indices = @transform_8, window_bounds = array<i64: 1, 256>}, {transform_indices = @transform_9, window_bounds = array<i64: 8, 128>}, {transform_indices = @transform_10, window_bounds = array<i64: 8, 128>}]} {
    %c0 = arith.constant 0 : index
    %c0_0 = arith.constant 0 : index
    %c0_1 = arith.constant 0 : index
    %0 = vector.load %arg1[%c0, %c0_0, %c0_1] : memref<4x8x128xf32, #tpu.memory_space<vmem>>, vector<4x8x128xf32>
    %c0_2 = arith.constant 0 : index
    %c0_3 = arith.constant 0 : index
    %c0_4 = arith.constant 0 : index
    %1 = vector.load %arg2[%c0_2, %c0_3, %c0_4] : memref<4x8x128xf32, #tpu.memory_space<vmem>>, vector<4x8x128xf32>
    %c0_5 = arith.constant 0 : index
    %c0_6 = arith.constant 0 : index
    %2 = vector.load %arg3[%c0_5, %c0_6] : memref<8x128xf32, #tpu.memory_space<vmem>>, vector<8x128xf32>
    %c0_7 = arith.constant 0 : index
    %c0_8 = arith.constant 0 : index
    %3 = vector.load %arg4[%c0_7, %c0_8] : memref<8x128xf32, #tpu.memory_space<vmem>>, vector<8x128xf32>
    %4 = arith.truncf %2 : vector<8x128xf32> to vector<8x128xbf16>
    %c0_9 = arith.constant 0 : index
    %c0_10 = arith.constant 0 : index
    %5 = vector.load %arg6[%c0_9, %c0_10] : memref<128x384xbf16, #tpu.memory_space<vmem>>, vector<128x384xbf16>
    %cst = arith.constant dense<0.000000e+00> : vector<8x384xf32>
    %6 = tpu.matmul %4, %5, %cst {dimension_numbers = #tpu.dot_dimension_numbers<[1], [0], [0], [1], [0, 0, 1, 1], [], []>} : vector<8x128xbf16>, vector<128x384xbf16>, vector<8x384xf32> -> vector<8x384xf32>
    %7 = vector.extract_strided_slice %6 {offsets = [0, 0], sizes = [8, 128], strides = [1, 1]} : vector<8x384xf32> to vector<8x128xf32>
    %cst_11 = arith.constant dense<0.000000e+00> : vector<8x128xf32>
    %8 = vector.multi_reduction <add>, %0, %cst_11 [0] : vector<4x8x128xf32> to vector<8x128xf32>
    %cst_12 = arith.constant 2.500000e-01 : f32
    %9 = vector.broadcast %cst_12 : f32 to vector<8x128xf32>
    %10 = arith.mulf %8, %9 : vector<8x128xf32>
    %11 = arith.truncf %10 : vector<8x128xf32> to vector<8x128xbf16>
    %c0_13 = arith.constant 0 : index
    %c0_14 = arith.constant 0 : index
    %12 = vector.load %arg7[%c0_13, %c0_14] : memref<128x256xbf16, #tpu.memory_space<vmem>>, vector<128x256xbf16>
    %cst_15 = arith.constant dense<0.000000e+00> : vector<8x256xf32>
    %13 = tpu.matmul %11, %12, %cst_15 {dimension_numbers = #tpu.dot_dimension_numbers<[1], [0], [0], [1], [0, 0, 1, 1], [], []>} : vector<8x128xbf16>, vector<128x256xbf16>, vector<8x256xf32> -> vector<8x256xf32>
    %c0_16 = arith.constant 0 : index
    %c0_17 = arith.constant 0 : index
    %14 = vector.load %arg8[%c0_16, %c0_17] : memref<1x128xf32, #tpu.memory_space<vmem>>, vector<1x128xf32>
    %15 = vector.broadcast %14 : vector<1x128xf32> to vector<8x128xf32>
    %16 = arith.addf %7, %15 : vector<8x128xf32>
    %17 = arith.truncf %0 : vector<4x8x128xf32> to vector<4x8x128xbf16>
    %18 = vector.shape_cast %17 : vector<4x8x128xbf16> to vector<32x128xbf16>
    %c0_18 = arith.constant 0 : index
    %c0_19 = arith.constant 0 : index
    %19 = vector.load %arg5[%c0_18, %c0_19] : memref<128x128xbf16, #tpu.memory_space<vmem>>, vector<128x128xbf16>
    %cst_20 = arith.constant dense<0.000000e+00> : vector<32x128xf32>
    %20 = tpu.matmul %18, %19, %cst_20 {dimension_numbers = #tpu.dot_dimension_numbers<[1], [0], [0], [1], [0, 0, 1, 1], [], []>} : vector<32x128xbf16>, vector<128x128xbf16>, vector<32x128xf32> -> vector<32x128xf32>
    %21 = vector.shape_cast %20 : vector<32x128xf32> to vector<4x8x128xf32>
    %22 = vector.shape_cast %16 : vector<8x128xf32> to vector<1x8x128xf32>
    %23 = vector.broadcast %22 : vector<1x8x128xf32> to vector<4x8x128xf32>
    %24 = arith.addf %21, %23 : vector<4x8x128xf32>
    %25 = arith.negf %24 : vector<4x8x128xf32>
    %26 = math.exp %25 : vector<4x8x128xf32>
    %cst_21 = arith.constant 1.000000e+00 : f32
    %27 = vector.broadcast %cst_21 : f32 to vector<4x8x128xf32>
    %28 = arith.addf %27, %26 : vector<4x8x128xf32>
    %29 = arith.divf %27, %28 : vector<4x8x128xf32>
    %30 = arith.mulf %29, %1 : vector<4x8x128xf32>
    %cst_22 = arith.constant dense<0.000000e+00> : vector<8x128xf32>
    %31 = vector.multi_reduction <add>, %30, %cst_22 [0] : vector<4x8x128xf32> to vector<8x128xf32>
    %32 = vector.extract_strided_slice %6 {offsets = [0, 128], sizes = [8, 256], strides = [1, 1]} : vector<8x384xf32> to vector<8x256xf32>
    %33 = arith.addf %13, %32 : vector<8x256xf32>
    %c0_23 = arith.constant 0 : index
    %c0_24 = arith.constant 0 : index
    %34 = vector.load %arg9[%c0_23, %c0_24] : memref<1x256xf32, #tpu.memory_space<vmem>>, vector<1x256xf32>
    %35 = vector.broadcast %34 : vector<1x256xf32> to vector<8x256xf32>
    %36 = arith.addf %33, %35 : vector<8x256xf32>
    %37 = arith.negf %36 : vector<8x256xf32>
    %38 = math.exp %37 : vector<8x256xf32>
    %cst_25 = arith.constant 1.000000e+00 : f32
    %39 = vector.broadcast %cst_25 : f32 to vector<8x256xf32>
    %40 = arith.addf %39, %38 : vector<8x256xf32>
    %41 = arith.divf %39, %40 : vector<8x256xf32>
    %42 = vector.extract_strided_slice %41 {offsets = [0, 0], sizes = [8, 128], strides = [1, 1]} : vector<8x256xf32> to vector<8x128xf32>
    %43 = vector.extract_strided_slice %41 {offsets = [0, 128], sizes = [8, 128], strides = [1, 1]} : vector<8x256xf32> to vector<8x128xf32>
    %44 = arith.mulf %42, %3 : vector<8x128xf32>
    %45 = arith.addf %31, %44 : vector<8x128xf32>
    %c0_26 = arith.constant 0 : index
    %c0_27 = arith.constant 0 : index
    %46 = vector.load %arg11[%c0_26, %c0_27] : memref<8x128xf32, #tpu.memory_space<vmem>>, vector<8x128xf32>
    tpu.vector_store %arg11[%c0_26, %c0_27], %45 {strides = array<i32>} : memref<8x128xf32, #tpu.memory_space<vmem>>, vector<8x128xf32>,
    %47 = math.tanh %45 : vector<8x128xf32>
    %48 = arith.mulf %43, %47 : vector<8x128xf32>
    %c0_28 = arith.constant 0 : index
    %c0_29 = arith.constant 0 : index
    %49 = vector.load %arg10[%c0_28, %c0_29] : memref<8x128xf32, #tpu.memory_space<vmem>>, vector<8x128xf32>
    tpu.vector_store %arg10[%c0_28, %c0_29], %48 {strides = array<i32>} : memref<8x128xf32, #tpu.memory_space<vmem>>, vector<8x128xf32>,
    return
  }
  func.func @transform_0(%arg0: i32) -> (i32, i32, i32) {
    %c0_i32 = arith.constant 0 : i32
    %c0_i32_0 = arith.constant 0 : i32
    %c0_i32_1 = arith.constant 0 : i32
    return %c0_i32, %arg0, %c0_i32_0 : i32, i32, i32
  }
  func.func @transform_1(%arg0: i32) -> (i32, i32, i32) {
    %c0_i32 = arith.constant 0 : i32
    %c0_i32_0 = arith.constant 0 : i32
    %c0_i32_1 = arith.constant 0 : i32
    return %c0_i32, %arg0, %c0_i32_0 : i32, i32, i32
  }
  func.func @transform_2(%arg0: i32) -> (i32, i32) {
    %c0_i32 = arith.constant 0 : i32
    %c0_i32_0 = arith.constant 0 : i32
    return %arg0, %c0_i32 : i32, i32
  }
  func.func @transform_3(%arg0: i32) -> (i32, i32) {
    %c0_i32 = arith.constant 0 : i32
    %c0_i32_0 = arith.constant 0 : i32
    return %arg0, %c0_i32 : i32, i32
  }
  func.func @transform_4(%arg0: i32) -> (i32, i32) {
    %c0_i32 = arith.constant 0 : i32
    %c0_i32_0 = arith.constant 0 : i32
    %c0_i32_1 = arith.constant 0 : i32
    return %c0_i32, %c0_i32_0 : i32, i32
  }
  func.func @transform_5(%arg0: i32) -> (i32, i32) {
    %c0_i32 = arith.constant 0 : i32
    %c0_i32_0 = arith.constant 0 : i32
    %c0_i32_1 = arith.constant 0 : i32
    return %c0_i32, %c0_i32_0 : i32, i32
  }
  func.func @transform_6(%arg0: i32) -> (i32, i32) {
    %c0_i32 = arith.constant 0 : i32
    %c0_i32_0 = arith.constant 0 : i32
    %c0_i32_1 = arith.constant 0 : i32
    return %c0_i32, %c0_i32_0 : i32, i32
  }
  func.func @transform_7(%arg0: i32) -> (i32, i32) {
    %c0_i32 = arith.constant 0 : i32
    %c0_i32_0 = arith.constant 0 : i32
    %c0_i32_1 = arith.constant 0 : i32
    return %c0_i32, %c0_i32_0 : i32, i32
  }
  func.func @transform_8(%arg0: i32) -> (i32, i32) {
    %c0_i32 = arith.constant 0 : i32
    %c0_i32_0 = arith.constant 0 : i32
    %c0_i32_1 = arith.constant 0 : i32
    return %c0_i32, %c0_i32_0 : i32, i32
  }
  func.func @transform_9(%arg0: i32) -> (i32, i32) {
    %c0_i32 = arith.constant 0 : i32
    %c0_i32_0 = arith.constant 0 : i32
    return %arg0, %c0_i32 : i32, i32
  }
  func.func @transform_10(%arg0: i32) -> (i32, i32) {
    %c0_i32 = arith.constant 0 : i32
    %c0_i32_0 = arith.constant 0 : i32
    return %arg0, %c0_i32 : i32, i32
  }
}

</mosaic_0001>

<bundles_post_ra>
// kernel: tpu_custom_call.1
= control target key start
LH: loop header
LB: loop body
LE: loop exit
PB: predicated region body
PF: predicated region fallthrough
CT: control target
= control target key end

     0   :  { %s2711_s0 = inlined_call_operand.hbm [shape: f32[4,16,128], index: 0, kind: input, shape index: {}]   ;;  %s2712_s1 = inlined_call_operand.hbm [shape: f32[4,16,128], index: 1, kind: input, shape index: {}]   ;;  %s2713_s2 = inlined_call_operand.hbm [shape: f32[16,128], index: 2, kind: input, shape index: {}]   ;;  %s2714_s3 = inlined_call_operand.hbm [shape: f32[16,128], index: 3, kind: input, shape index: {}]   ;;  %s2715_s4 = inlined_call_operand.hbm [shape: bf16[128,128], index: 4, kind: input, shape index: {}]   ;;  %s2716_s5 = inlined_call_operand.hbm [shape: bf16[128,384], index: 5, kind: input, shape index: {}]   ;;  %s2717_s6 = inlined_call_operand.hbm [shape: bf16[128,256], index: 6, kind: input, shape index: {}]   ;;  %s2718_s7 = inlined_call_operand.hbm [shape: f32[1,128], index: 7, kind: input, shape index: {}]   ;;  %s2719_s8 = inlined_call_operand.hbm [shape: f32[1,256], index: 8, kind: input, shape index: {}]   ;;  %s2720_s9 = inlined_call_operand.hbm [shape: f32[16,128], index: 9, kind: output, shape index: {0}]   ;;  %s2721_s10 = inlined_call_operand.hbm [shape: f32[16,128], index: 10, kind: output, shape index: {1}]  }
   0x1   :  { %2746 = sst [smem:[#allocation34_spill]] %s2712_s1 }
   0x2   :  { %2747 = sst [smem:[#allocation35_spill]] %s2715_s4 }
   0x3   :  { %2748 = sst [smem:[#allocation36_spill]] %s2716_s5 }
   0x4   :  { %2749 = sst [smem:[#allocation37_spill]] %s2718_s7 }
   0x5   :  { %2750 = sst [smem:[#allocation38_spill]] %s2720_s9 }
   0x6   :  { %2751 = sst [smem:[#allocation39_spill]] %s2721_s10 }
   0x7   :  { %16 = vsyncpa [#allocation3], 0 }
   0x8   :  { %18 = vsyncpa [#allocation3 + $0x1], 0 }
   0x9   :  { %19 = vsyncpa [#allocation6], 0 }
   0xa   :  { %21 = vsyncpa [#allocation6 + $0x1], 0 }
   0xb   :  { %22 = vsyncpa [#allocation9], 0 }
   0xc   :  { %24 = vsyncpa [#allocation9 + $0x1], 0 }
   0xd   :  { %25 = vsyncpa [#allocation12], 0 }
   0xe   :  { %26 = vsyncpa [#allocation15], 0 }
   0xf   :  { %27 = vsyncpa [#allocation4], 0 }
  0x10   :  { %29 = vsyncpa [#allocation4 + $0x1], 0 }
  0x11   :  { %30 = vsyncpa [#allocation19], 0 }
  0x12   :  { %32 = vsyncpa [#allocation19 + $0x1], 0  ;;  %s2237_s13 = smov 0   ;;  %s2239_s14 = smov 0  }
  0x13   :  { %s2241_s15 = smov 0   ;;  %s2243_s16 = smov 0  }
  0x14 LB: > { %2752 = sst [smem:[#allocation28_spill]] %s2147_s13  ;;  %s2258_s17 = sadd.s32 4294967295, %s2159_s16   ;;  %s2159_s16 = sphi %s2243_s16, %s2798_s16   ;;  %s2155_s15 = sphi %s2241_s15, %s2800_s15   ;;  %s2151_s14 = sphi %s2239_s14, %s2802_s14   ;;  %s2147_s13 = sphi %s2237_s13, %s2801_s13  }
  0x15   : > { %2753 = sst [smem:[#allocation29_spill]] %s2155_s15  ;;  %s1412_s18 = sadd.s32 4294967294, %s2159_s16  }
  0x16   : > { %p58_p0 = scmp.ne.s32.totalorder %s2151_s14, %s2147_s13  ;;  %p2722_p1 = scmp.eq.s32.totalorder %s2258_s17, 0 }
  0x17   : > { %p271_p3 = scmp.eq.s32.totalorder %s1412_s18, 1  ;;  %p1413_p5 = scmp.ge.s32.totalorder %s2159_s16, 1 }
  0x18   : > { %p2267_p4 = por %p2722_p1, %p58_p0  ;;  %p304_p7 = scmp.lt.s32.totalorder %s2159_s16, 3 }
  0x19   : > { %p2272_p6 = por %p271_p3, %p58_p0  ;;  %s2161_s22 = smov [#allocation10]  }
  0x1a   : > { %s2754_s19 = scalar_select %p2267_p4, 1, 0 }
  0x1b   : > { %s2755_s20 = scalar_select %p2272_p6, 1, 0 }
  0x1c   : > { %p2277_p8 = pnand %p1413_p5, %p304_p7  ;;  %s316_s23 = sshll.u32 %s2161_s22, 4  ;;  %s2281_s23 = int_to_ptr.vmem [resolvable:$true] %s316_s23 }
  0x1d   : > { %2756 = sst [smem:[#allocation30_spill]] %s2755_s20  ;;  %s2162_s25 = smov [#allocation11]  }
  0x1e   : > { %s2757_s21 = scalar_select %p2277_p8, 1, 0 }
  0x1f   : > { %p1596_p9 = pneg %p2277_p8  ;;  %s329_s26 = sshll.u32 %s2162_s25, 4  ;;  %s2292_s26 = int_to_ptr.vmem [resolvable:$true] %s329_s26 }
  0x20   : > { %s2759_s4 = sld [smem:[#allocation35_spill]] }
  0x21   : > { %p2288_p11 = pnand %p1596_p9, %p2722_p1 }
  0x23   : > { %s2758_s24 = scalar_select %p2288_p11, 1, 0 }
  0x24   : > { %p2302_p13 = pneg %p2288_p11 }
  0x26   : > { %s1781_s29 = scalar_lea.hbm %s2759_s4, 1024 }
  0x27   : > { %p1782_p12 = scmp.ne.s32.totalorder %s2759_s4, %s1781_s29  ;;  %p1788_p5 = scmp.lt.u32.totalorder %s1781_s29, %s2759_s4 }
  0x28   : > { %s2760_s12 = scalar_select %p2302_p13, 1, 0 }
  0x29   : > { %p1784_p0 = pnand %p2302_p13, %p1782_p12 }
  0x2b   : > { %p1785_p3 = pneg %p1784_p0 }
  0x2d   : > { %p1790_p7 = pnand %p1788_p5, %p1785_p3 }
  0x2f   : > { %1793 = shalt.err (!%p1790_p7)
}
  0x30   : > { %s1794_s25 = scalar_lea.vmem %s2281_s23, 1024  ;;  %p1802_p2 = scmp.lt.s32.totalorder %s2281_s23, %s2281_s23 }
  0x31   : > { %p1795_p9 = scmp.ne.s32.totalorder %s2281_s23, %s1794_s25  ;;  %p1803_p6 = scmp.lt.s32.totalorder %s1794_s25, %s1794_s25 }
  0x33   : > { %p1797_p10 = pnand %p1795_p9, %p2302_p13  ;;  %p1804_p12 = por %p1803_p6, %p1802_p2 }
  0x35   : > { %p1798_p1 = pneg %p1797_p10 }
  0x37   : > { %p1805_p0 = pnand %p1804_p12, %p1798_p1 }
  0x39   : > { %1808 = shalt.err (!%p1805_p0)
}
  0x3a   : > { %s2163_s27 = smov 64   ;;  %s2164_s28 = smov 4  }
  0x3b   : > { %1599 = dma.hbm_to_vmem [thread:$0]  (!%p2288_p11), %s2759_s4, 1024, %s2281_s23, [#allocation9], %s2163_s27, %s2163_s27, %s2164_s28  }
  0x3c   : > { %s2761_s5 = sld [smem:[#allocation36_spill]] }
  0x42   : > { %s1809_s22 = scalar_lea.hbm %s2761_s5, 3072 }
  0x43   : > { %p1810_p2 = scmp.ne.s32.totalorder %s2761_s5, %s1809_s22  ;;  %p1816_p10 = scmp.lt.u32.totalorder %s1809_s22, %s2761_s5 }
  0x45   : > { %p1812_p1 = pnand %p1810_p2, %p2302_p13 }
  0x47   : > { %p1813_p6 = pneg %p1812_p1 }
  0x49   : > { %p1818_p3 = pnand %p1816_p10, %p1813_p6 }
  0x4b   : > { %1821 = shalt.err (!%p1818_p3)
}
  0x4c   : > { %s1822_s23 = scalar_lea.vmem %s2292_s26, 3072  ;;  %p1830_p12 = scmp.lt.s32.totalorder %s2292_s26, %s2292_s26 }
  0x4d   : > { %p1823_p5 = scmp.ne.s32.totalorder %s2292_s26, %s1822_s23  ;;  %p1831_p0 = scmp.lt.s32.totalorder %s1822_s23, %s1822_s23 }
  0x4f   : > { %p1825_p7 = pnand %p1823_p5, %p2302_p13  ;;  %p1832_p2 = por %p1831_p0, %p1830_p12 }
  0x51   : > { %p1826_p9 = pneg %p1825_p7 }
  0x53   : > { %p1833_p1 = pnand %p1832_p2, %p1826_p9 }
  0x55   : > { %1836 = shalt.err (!%p1833_p1)
}
  0x56   : > { %s2165_s13 = smov 192   ;;  %s2166_s9 = smov 12  }
  0x57   : > { %1602 = dma.hbm_to_vmem [thread:$0]  (!%p2288_p11), %s2761_s5, 3072, %s2292_s26, [#allocation12], %s2165_s13, %s2165_s13, %s2166_s9  }
  0x58   : > { %s2167_s28 = smov [#allocation14]   ;;  %s2347_s30 = sadd.s32 1, %s2159_s16  }
  0x59   : > { %s356_s29 = sshll.u32 %s2167_s28, 4  ;;  %2762 = sst [smem:[#allocation31_spill]] %s2347_s30  ;;  %s357_s29 = int_to_ptr.vmem [resolvable:$true] %s356_s29 }
  0x5a   : > { %s2763_s7 = sld [smem:[#allocation37_spill]] }
  0x60   : > { %s1837_s22 = scalar_lea.hbm %s2763_s7, 16 }
  0x61   : > { %p1838_p6 = scmp.ne.s32.totalorder %s2763_s7, %s1837_s22  ;;  %p1844_p5 = scmp.lt.u32.totalorder %s1837_s22, %s2763_s7 }
  0x63   : > { %p1840_p10 = pnand %p1838_p6, %p2302_p13 }
  0x65   : > { %p1841_p3 = pneg %p1840_p10 }
  0x67   : > { %p1846_p7 = pnand %p1844_p5, %p1841_p3 }
  0x69   : > { %1849 = shalt.err (!%p1846_p7)
}
  0x6a   : > { %s1850_s26 = scalar_lea.vmem %s357_s29, 16  ;;  %s1857_s13 = scalar_lea.vmem %s357_s29, 32 }
  0x6b   : > { %p1851_p9 = scmp.ne.s32.totalorder %s357_s29, %s1850_s26  ;;  %p1858_p2 = scmp.lt.s32.totalorder %s357_s29, %s357_s29 }
  0x6c   : > { %p1859_p1 = scmp.lt.s32.totalorder %s1857_s13, %s1850_s26 }
  0x6d   : > { %p1853_p12 = pnand %p1851_p9, %p2302_p13 }
  0x6e   : > { %p1860_p4 = por %p1859_p1, %p1858_p2 }
  0x6f   : > { %p1854_p0 = pneg %p1853_p12 }
  0x71   : > { %p1861_p8 = pnand %p1860_p4, %p1854_p0 }
  0x73   : > { %1864 = shalt.err (!%p1861_p8)
}
  0x74   : > { %1608 = dma.hbm_to_vmem [thread:$0]  (!%p2288_p11), %s2763_s7, 16, %s357_s29, [#allocation15]  }
  0x75   : > { %s42_s4 = ssub.s32 %s2159_s16, %s2347_s30  ;;  %s45_s10 = sadd.s32 1, %s2155_s15 }
  0x76   : > { %p43_p4 = scmp.eq.s32.totalorder %s42_s4, 0  ;;  %p52_p8 = scmp.ne.s32.totalorder %s2155_s15, %s2151_s14 }
  0x77   : > { %p53_p6 = scmp.eq.s32.totalorder %s2159_s16, 0  ;;  %p2765_p3 = scmp.eq.s32.totalorder %s2258_s17, 1 }
  0x78   : > { %s2374_s27 = scalar_select %p43_p4, %s2155_s15, %s45_s10  }
  0x79   : > { %p54_p10 = por %p53_p6, %p52_p8  ;;  %p2378_p5 = por %p2765_p3, %p52_p8 }
  0x7a   : > { %2764 = sst [smem:[#allocation32_spill]] %s2374_s27  ;;  %p1637_p7 = scmp.lt.s32.totalorder %s2159_s16, 2 }
  0x7b   : > { %s2766_s28 = scalar_select %p2378_p5, 1, 0 }
  0x7c   : > { %s2384_s11 = sand.u32 1, %s2155_s15   ;;  %s2387_s29 = sshll.u32 %s2159_s16, 7 }
  0x7d   : > { %2767 = sst [smem:[#allocation33_spill]] %s2766_s28  ;;  %s2729_s18 = sshll.u32 %s2384_s11, 5 }
  0x7e   : > { %p2390_p9 = pnand %p1637_p7, %p54_p10  ;;  %s2730_s25 = sand.u32 1, %s2159_s16  }
  0x7f   : > { %s2769_s1 = sld [smem:[#allocation34_spill]]  ;;  %s402_s9 = scalar_lea.vmem [#allocation5], %s2729_s18 }
  0x80   : > { %s2768_s22 = scalar_select %p2390_p9, 1, 0 }
  0x81   : > { %s408_s20 = sshll.u32 %s402_s9, 4  ;;  %s2168_s4 = smov [#allocation13]   ;;  %s2403_s20 = int_to_ptr.vmem [resolvable:$true] %s408_s20 }
  0x82   : > { %s2405_s10 = sshll.u32 %s2168_s4, 4  ;;  %s2409_s5 = scalar_lea.sflag [#allocation6], %s2730_s25  ;;  %s343_s10 = int_to_ptr.vmem [resolvable:$true] %s2405_s10 }
  0x83   : > { %p2415_p0 = pneg %p2390_p9 }
  0x85   : > { %s2399_s13 = scalar_lea.hbm %s2769_s1, %s2387_s29  ;;  %s1870_s18 = scalar_lea.hbm %s2769_s1, 1024 }
  0x86   : > { %s1865_s7 = scalar_lea.hbm %s2399_s13, 512  ;;  %p1871_p4 = scmp.lt.u32.totalorder %s2399_s13, %s2769_s1 }
  0x87   : > { %p1866_p12 = scmp.ne.s32.totalorder %s2399_s13, %s1865_s7  ;;  %p1872_p8 = scmp.lt.u32.totalorder %s1870_s18, %s1865_s7 }
  0x88   : > { %s2770_s23 = scalar_select %p2415_p0, 1, 0 }
  0x89   : > { %p1868_p2 = pnand %p2415_p0, %p1866_p12  ;;  %p1873_p6 = por %p1872_p8, %p1871_p4 }
  0x8a   : > { %p1874_p10 = scmp.lt.u32.totalorder %s1865_s7, %s2399_s13 }
  0x8b   : > { %p1869_p1 = pneg %p1868_p2 }
  0x8c   : > { %p1875_p3 = por %p1874_p10, %p1873_p6 }
  0x8e   : > { %p1876_p7 = pnand %p1875_p3, %p1869_p1 }
  0x90   : > { %1879 = shalt.err (!%p1876_p7)
}
  0x91   : > { %s1880_s25 = scalar_lea.vmem %s2403_s20, 512  ;;  %s2169_s26 = smov [#allocation5]  }
  0x92   : > { %p1881_p12 = scmp.ne.s32.totalorder %s2403_s20, %s1880_s25  ;;  %s1885_s9 = sshll.u32 %s2169_s26, 4  ;;  %s1886_s9 = int_to_ptr.vmem [resolvable:$false] %s1885_s9 }
  0x93   : > { %s1887_s27 = scalar_lea.vmem %s1886_s9, 1024  ;;  %p1888_p11 = scmp.lt.s32.totalorder %s2403_s20, %s1886_s9 }
  0x94   : > { %p1883_p2 = pnand %p1881_p12, %p2415_p0  ;;  %p1889_p13 = scmp.lt.s32.totalorder %s1887_s27, %s1880_s25 }
  0x96   : > { %p1884_p5 = pneg %p1883_p2  ;;  %p1890_p4 = por %p1889_p13, %p1888_p11 }
  0x98   : > { %p1891_p8 = pnand %p1890_p4, %p1884_p5 }
  0x9a   : > { %1894 = shalt.err (!%p1891_p8)
}
  0x9b   : > { %s2743_s7 = smov 256   ;;  %s2171_s18 = smov 128  }
  0x9c   : > { %s2172_s4 = smov 8   ;;  %s1895_s9 = scalar_lea.hbm %s2717_s6, 2048 }
  0x9d   : > { %1618 = dma.hbm_to_vmem [thread:$0]  (!%p2390_p9), %s2399_s13, 512, %s2403_s20, %s2409_s5, %s2743_s7, %s2171_s18, %s2172_s4  }
  0x9e   : > { %p1896_p11 = scmp.ne.s32.totalorder %s2717_s6, %s1895_s9  ;;  %p2771_p13 = scmp.ne.s32.totalorder %s2760_s12, 0 }
  0x9f   : > { %p1902_p6 = scmp.lt.u32.totalorder %s1895_s9, %s2717_s6 }
  0xa0   : > { %p1898_p5 = pnand %p1896_p11, %p2771_p13 }
  0xa2   : > { %p1899_p1 = pneg %p1898_p5 }
  0xa4   : > { %p1904_p10 = pnand %p1902_p6, %p1899_p1 }
  0xa6   : > { %1907 = shalt.err (!%p1904_p10)
}
  0xa7   : > { %s1908_s28 = scalar_lea.vmem %s343_s10, 2048  ;;  %p1916_p2 = scmp.lt.s32.totalorder %s343_s10, %s343_s10 }
  0xa8   : > { %p1909_p3 = scmp.ne.s32.totalorder %s343_s10, %s1908_s28  ;;  %p1917_p4 = scmp.lt.s32.totalorder %s1908_s28, %s1908_s28 }
  0xaa   : > { %p1911_p7 = pnand %p1909_p3, %p2771_p13  ;;  %p1918_p8 = por %p1917_p4, %p1916_p2 }
  0xac   : > { %p1912_p12 = pneg %p1911_p7 }
  0xae   : > { %p1919_p9 = pnand %p1918_p8, %p1912_p12 }
  0xb0   : > { %1922 = shalt.err (!%p1919_p9)
}
  0xb1   : > { %p2772_p11 = scmp.ne.s32.totalorder %s2758_s24, 0  ;;  %s2173_s30 = smov [#allocation16]  }
  0xb2   : > { %s367_s13 = sshll.u32 %s2173_s30, 4  ;;  %s1923_s28 = scalar_lea.hbm %s2719_s8, 32  ;;  %s368_s13 = int_to_ptr.vmem [resolvable:$true] %s367_s13 }
  0xb3   : > { %1605 = dma.hbm_to_vmem [thread:$0]  (!%p2772_p11), %s2717_s6, 2048, %s343_s10, [#allocation12], %s2171_s18, %s2171_s18, %s2172_s4  }
  0xb4   : > { %p1924_p9 = scmp.ne.s32.totalorder %s2719_s8, %s1923_s28  ;;  %p1930_p6 = scmp.lt.u32.totalorder %s1923_s28, %s2719_s8 }
  0xb6   : > { %p1926_p5 = pnand %p1924_p9, %p2771_p13 }
  0xb8   : > { %p1927_p1 = pneg %p1926_p5 }
  0xba   : > { %p1932_p10 = pnand %p1930_p6, %p1927_p1 }
  0xbc   : > { %1935 = shalt.err (!%p1932_p10)
}
  0xbd   : > { %s1936_s10 = scalar_lea.vmem %s368_s13, 32  ;;  %p1944_p2 = scmp.lt.s32.totalorder %s368_s13, %s368_s13 }
  0xbe   : > { %p1937_p3 = scmp.ne.s32.totalorder %s368_s13, %s1936_s10  ;;  %p1945_p4 = scmp.lt.s32.totalorder %s1936_s10, %s1936_s10 }
  0xc0   : > { %p1939_p7 = pnand %p1937_p3, %p2771_p13  ;;  %p1946_p8 = por %p1945_p4, %p1944_p2 }
  0xc2   : > { %p1940_p12 = pneg %p1939_p7 }
  0xc4   : > { %p1947_p0 = pnand %p1946_p8, %p1940_p12 }
  0xc6   : > { %1950 = shalt.err (!%p1947_p0)
}
  0xc7   : > { %1611 = dma.hbm_to_vmem [thread:$0]  (!%p2772_p11), %s2719_s8, 32, %s368_s13, [#allocation15]  }
  0xc8   : > { %s2486_s30 = scalar_lea.hbm %s2711_s0, %s2387_s29  ;;  %s2773_s20 = sshll.u32 %s2384_s11, 5 }
  0xc9   : > { %s382_s24 = scalar_lea.vmem [#allocation2], %s2773_s20  ;;  %s1424_s28 = sshll.u32 %s2384_s11, 3 }
  0xca   : > { %s388_s26 = sshll.u32 %s382_s24, 4  ;;  %s379_s25 = scalar_lea.sflag [#allocation3], %s2384_s11  ;;  %s2490_s26 = int_to_ptr.vmem [resolvable:$true] %s388_s26 }
  0xcb   : > { %s1951_s9 = scalar_lea.hbm %s2486_s30, 512  ;;  %p2774_p13 = scmp.ne.s32.totalorder %s2770_s23, 0 }
  0xcc   : > { %p1952_p0 = scmp.ne.s32.totalorder %s2486_s30, %s1951_s9  ;;  %s1956_s10 = scalar_lea.hbm %s2711_s0, 1024 }
  0xcd   : > { %p1957_p5 = scmp.lt.u32.totalorder %s2486_s30, %s2711_s0  ;;  %p1958_p1 = scmp.lt.u32.totalorder %s1956_s10, %s1951_s9 }
  0xce   : > { %p1954_p11 = pnand %p1952_p0, %p2774_p13  ;;  %p1960_p10 = scmp.lt.u32.totalorder %s1951_s9, %s2486_s30 }
  0xcf   : > { %p1959_p6 = por %p1958_p1, %p1957_p5 }
  0xd0   : > { %p1955_p9 = pneg %p1954_p11 }
  0xd1   : > { %p1961_p3 = por %p1960_p10, %p1959_p6 }
  0xd3   : > { %p1962_p7 = pnand %p1961_p3, %p1955_p9 }
  0xd5   : > { %1965 = shalt.err (!%p1962_p7)
}
  0xd6   : > { %s1966_s7 = scalar_lea.vmem %s2490_s26, 512  ;;  %s2174_s12 = smov [#allocation2]  }
  0xd7   : > { %p1967_p12 = scmp.ne.s32.totalorder %s2490_s26, %s1966_s7  ;;  %s1971_s20 = sshll.u32 %s2174_s12, 4  ;;  %s1972_s20 = int_to_ptr.vmem [resolvable:$false] %s1971_s20 }
  0xd8   : > { %s1973_s24 = scalar_lea.vmem %s1972_s20, 1024  ;;  %p1974_p8 = scmp.lt.s32.totalorder %s2490_s26, %s1972_s20 }
  0xd9   : > { %p1969_p2 = pnand %p1967_p12, %p2774_p13  ;;  %p1975_p0 = scmp.lt.s32.totalorder %s1973_s24, %s1966_s7 }
  0xdb   : > { %p1970_p4 = pneg %p1969_p2  ;;  %p1976_p11 = por %p1975_p0, %p1974_p8 }
  0xdd   : > { %p1977_p5 = pnand %p1976_p11, %p1970_p4 }
  0xdf   : > { %1980 = shalt.err (!%p1977_p5)
}
  0xe0   : > { %p2775_p9 = scmp.ne.s32.totalorder %s2768_s22, 0  ;;  %s2776_s9 = smov 256  }
  0xe1   : > { %s2524_s10 = scalar_lea.hbm %s2713_s2, %s2387_s29  ;;  %s422_s1 = scalar_lea.vmem [#allocation7], %s1424_s28 }
  0xe2   : > { %1615 = dma.hbm_to_vmem [thread:$0]  (!%p2775_p9), %s2486_s30, 512, %s2490_s26, %s379_s25, %s2776_s9, %s2171_s18, %s2172_s4  }
  0xe3   : > { %s429_s15 = sshll.u32 %s422_s1, 4  ;;  %s1981_s7 = scalar_lea.hbm %s2524_s10, 128  ;;  %s430_s15 = int_to_ptr.vmem [resolvable:$true] %s429_s15 }
  0xe4   : > { %p1982_p1 = scmp.ne.s32.totalorder %s2524_s10, %s1981_s7  ;;  %s1986_s4 = scalar_lea.hbm %s2713_s2, 256 }
  0xe5   : > { %p1987_p3 = scmp.lt.u32.totalorder %s2524_s10, %s2713_s2  ;;  %p1988_p7 = scmp.lt.u32.totalorder %s1986_s4, %s1981_s7 }
  0xe6   : > { %p1984_p6 = pnand %p1982_p1, %p2774_p13  ;;  %p1990_p2 = scmp.lt.u32.totalorder %s1981_s7, %s2524_s10 }
  0xe7   : > { %p1989_p12 = por %p1988_p7, %p1987_p3 }
  0xe8   : > { %p1985_p10 = pneg %p1984_p6 }
  0xe9   : > { %p1991_p4 = por %p1990_p2, %p1989_p12 }
  0xeb   : > { %p1992_p8 = pnand %p1991_p4, %p1985_p10 }
  0xed   : > { %1995 = shalt.err (!%p1992_p8)
}
  0xee   : > { %s1996_s25 = scalar_lea.vmem %s430_s15, 128  ;;  %s2175_s20 = smov [#allocation7]  }
  0xef   : > { %p1997_p0 = scmp.ne.s32.totalorder %s430_s15, %s1996_s25  ;;  %s2001_s24 = sshll.u32 %s2175_s20, 4  ;;  %s2002_s24 = int_to_ptr.vmem [resolvable:$false] %s2001_s24 }
  0xf0   : > { %s2003_s9 = scalar_lea.vmem %s2002_s24, 256  ;;  %p2004_p1 = scmp.lt.s32.totalorder %s430_s15, %s2002_s24 }
  0xf1   : > { %p1999_p11 = pnand %p1997_p0, %p2774_p13  ;;  %p2005_p6 = scmp.lt.s32.totalorder %s2003_s9, %s1996_s25 }
  0xf3   : > { %p2000_p5 = pneg %p1999_p11  ;;  %p2006_p9 = por %p2005_p6, %p2004_p1 }
  0xf5   : > { %p2007_p3 = pnand %p2006_p9, %p2000_p5 }
  0xf7   : > { %2010 = shalt.err (!%p2007_p3)
}
  0xf8   : > { %p2777_p7 = scmp.ne.s32.totalorder %s2768_s22, 0  ;;  %s2550_s1 = scalar_lea.hbm %s2714_s3, %s2387_s29 }
  0xf9   : > { %s440_s7 = scalar_lea.vmem [#allocation8], %s1424_s28  ;;  %s2778_s18 = sand.u32 1, %s2159_s16  }
  0xfa   : > { %1621 = dma.hbm_to_vmem [thread:$0]  (!%p2777_p7), %s2524_s10, 128, %s430_s15, %s2409_s5  }
  0xfb   : > { %s447_s12 = sshll.u32 %s440_s7, 4  ;;  %s437_s4 = scalar_lea.sflag [#allocation9], %s2778_s18  ;;  %s448_s12 = int_to_ptr.vmem [resolvable:$true] %s447_s12 }
  0xfc   : > { %s2011_s30 = scalar_lea.hbm %s2550_s1, 128  ;;  %s2016_s29 = scalar_lea.hbm %s2714_s3, 256 }
  0xfd   : > { %p2012_p9 = scmp.ne.s32.totalorder %s2550_s1, %s2011_s30  ;;  %p2017_p2 = scmp.lt.u32.totalorder %s2550_s1, %s2714_s3 }
  0xfe   : > { %p2018_p4 = scmp.lt.u32.totalorder %s2016_s29, %s2011_s30  ;;  %p2020_p0 = scmp.lt.u32.totalorder %s2011_s30, %s2550_s1 }
  0xff   : > { %p2014_p10 = pnand %p2012_p9, %p2774_p13 }
 0x100   : > { %p2019_p8 = por %p2018_p4, %p2017_p2 }
 0x101   : > { %p2015_p12 = pneg %p2014_p10 }
 0x102   : > { %p2021_p11 = por %p2020_p0, %p2019_p8 }
 0x104   : > { %p2022_p5 = pnand %p2021_p11, %p2015_p12 }
 0x106   : > { %2025 = shalt.err (!%p2022_p5)
}
 0x107   : > { %s2026_s28 = scalar_lea.vmem %s448_s12, 128  ;;  %s2176_s26 = smov [#allocation8]  }
 0x108   : > { %p2027_p1 = scmp.ne.s32.totalorder %s448_s12, %s2026_s28  ;;  %s2031_s25 = sshll.u32 %s2176_s26, 4  ;;  %s2032_s25 = int_to_ptr.vmem [resolvable:$false] %s2031_s25 }
 0x109   : > { %s2033_s20 = scalar_lea.vmem %s2032_s25, 256  ;;  %p2034_p9 = scmp.lt.s32.totalorder %s448_s12, %s2032_s25 }
 0x10a   : > { %p2029_p6 = pnand %p2027_p1, %p2774_p13  ;;  %p2035_p10 = scmp.lt.s32.totalorder %s2033_s20, %s2026_s28 }
 0x10c   : > { %p2030_p3 = pneg %p2029_p6  ;;  %p2036_p7 = por %p2035_p10, %p2034_p9 }
 0x10e   : > { %p2037_p2 = pnand %p2036_p7, %p2030_p3 }
 0x110   : > { %2040 = shalt.err (!%p2037_p2)
}
 0x111   : > { %p2779_p4 = scmp.ne.s32.totalorder %s2768_s22, 0  ;;  %p2780_p12 = scmp.ne.s32.totalorder %s2757_s21, 0 }
 0x112   : > { %s2576_s23 = sand.u32 (!%p2780_p12), 1, %s2151_s14   ;;  %p2781_p13 = scmp.ne.s32.totalorder (!%p2780_p12), %s2754_s19, 0 }
 0x113   : > { %1624 = dma.hbm_to_vmem [thread:$0]  (!%p2779_p4), %s2550_s1, 128, %s448_s12, %s437_s4  }
 0x114   : > { %456 = sbr.rel (%p2780_p12) target bundleno = 658 (0x292), region = 56  ;;  %s1429_s24 = sshll.u32 (!%p2780_p12), %s2576_s23, 5 }
 0x115   : > { %s459_s9 = scalar_lea.sflag (!%p2780_p12), [#allocation3], %s2576_s23  ;;  %s2580_s13 = scalar_lea.vmem (!%p2780_p12), [#allocation2], %s1429_s24 }
 0x11b   : > { %2114 = dma.done.wait (%p2781_p13), %s459_s9, 512  }
 0x11c   : > { %2116 = vsyncadd (%p2781_p13), %s459_s9, 4294966784  ;;  %s467_s22 = sand.u32 1, %s2258_s17   ;;  %s2587_s27 = scalar_lea.vmem [#allocation5], %s1429_s24 }
 0x11d   : > { %s468_s21 = scalar_lea.sflag [#allocation6], %s467_s22 }
 0x11e   : > { %2118 = dma.done.wait (%p2781_p13), %s468_s21, 640  }
 0x11f   : > { %2120 = vsyncadd (%p2781_p13), %s468_s21, 4294966656  ;;  %s2594_s1 = sshll.u32 %s2576_s23, 3  ;;  %s486_s12 = scalar_lea.sflag [#allocation9], %s467_s22 }
 0x120   : > { %s480_s7 = scalar_lea.vmem [#allocation7], %s2594_s1  ;;  %s489_s18 = scalar_lea.vmem [#allocation8], %s2594_s1 }
 0x121   : > { %2122 = dma.done.wait (%p2781_p13), %s486_s12, 128  }
 0x122   : > { %2124 = vsyncadd (%p2781_p13), %s486_s12, 4294967168  ;;  %p2782_p7 = scmp.eq.s32.totalorder %s2258_s17, 0 }
 0x124   : > { %2126 = dma.done.wait (%p2782_p7), [#allocation9], 1024   ;;  %p2783_p8 = pmov %p2782_p7 }
 0x125   : > { %p2784_p0 = pmov %p2782_p7 }
 0x126   : > { %2128 = vsyncadd (%p2783_p8), [#allocation9], 4294966272 }
 0x127   : > { %2130 = dma.done.wait (%p2784_p0), [#allocation12], 5120   ;;  %p2785_p11 = pmov %p2784_p0 }
 0x128   : > { %p2786_p5 = pmov %p2784_p0 }
 0x129   : > { %2132 = vsyncadd (%p2785_p11), [#allocation12], 4294962176 }
 0x12a   : > { %2134 = dma.done.wait (%p2786_p5), [#allocation15], 48   ;;  %p2787_p1 = pmov %p2784_p0 }
 0x12b   : > { %v2177_v0 = vmov 0.0   ;;  %v2178_v1 = vmov 0   ;;  %vm2179_vm0 = vmmov 0   ;;  %v1691_v2 = vld [vmem:[#allocation11 + $0x4] ss:$12 sps:$4 sm:$0xff]   ;;  %v1730_v32 = vld [vmem:[#allocation10 + $0x8] sm:$0xff]  }
 0x12c   : > { %2136 = vsyncadd (%p2787_p1), [#allocation15], 4294967248  ;;  %1524 = vmatprep.subr.bf16.mxu1 %v2177_v0  ;;  %770 = vmatprep.mubr.bf16.mxu0 %v2178_v1  ;;  %v1693_v3 = vld [vmem:[#allocation11 + $0x8] ss:$12 sps:$4 sm:$0xff]   ;;  %v1694_v4 = vld [vmem:[#allocation11] ss:$12 sps:$4 sm:$0xff]  }
 0x12d   : > { %1540 = vmatprep.mubr.msk.bf16.mxu1 %vm2179_vm0, %v2177_v0  ;;  %738 = vmatprep.subr.bf16.mxu0 %v1691_v2  ;;  %v1695_v5 = vld [vmem:[#allocation11 + $0x1c] ss:$12 sps:$4 sm:$0xff]   ;;  %v1697_v6 = vld [vmem:[#allocation11 + $0x20] ss:$12 sps:$4 sm:$0xff]   ;;  %v1698_v7 = vld [vmem:[#allocation11 + $0x18] ss:$12 sps:$4 sm:$0xff]  }
 0x12e   : > { %1525 = vmatpush3.bf16.msra.mxu1 %v1693_v3  ;;  %739 = vmatpush1.bf16.msra.mxu0 %v1694_v4  ;;  %v1699_v8 = vld [vmem:[#allocation11 + $0x34] ss:$12 sps:$4 sm:$0xff]   ;;  %v1701_v9 = vld [vmem:[#allocation11 + $0x38] ss:$12 sps:$4 sm:$0xff]   ;;  %v1702_v10 = vld [vmem:[#allocation11 + $0x30] ss:$12 sps:$4 sm:$0xff]  }
 0x12f   : > { %1526 = vmatprep.subr.bf16.mxu1 %v2177_v0  ;;  %740 = vmatprep.subr.bf16.mxu0 %v1695_v5  ;;  %v1703_v11 = vld [vmem:[#allocation11 + $0x4c] ss:$12 sps:$4 sm:$0xff]   ;;  %v1705_v12 = vld [vmem:[#allocation11 + $0x50] ss:$12 sps:$4 sm:$0xff]   ;;  %v1706_v13 = vld [vmem:[#allocation11 + $0x48] ss:$12 sps:$4 sm:$0xff]  }
 0x130   : > { %v1707_v14 = vld [vmem:[#allocation11 + $0x64] ss:$12 sps:$4 sm:$0xff]   ;;  %v1709_v15 = vld [vmem:[#allocation11 + $0x68] ss:$12 sps:$4 sm:$0xff]   ;;  %v1710_v16 = vld [vmem:[#allocation11 + $0x60] ss:$12 sps:$4 sm:$0xff]  }
 0x131   : > { %v1711_v17 = vld [vmem:[#allocation11 + $0x7c] ss:$12 sps:$4 sm:$0xff]   ;;  %v1713_v18 = vld [vmem:[#allocation11 + $0x80] ss:$12 sps:$4 sm:$0xff]   ;;  %v1714_v19 = vld [vmem:[#allocation11 + $0x78] ss:$12 sps:$4 sm:$0xff]  }
 0x132   : > { %1527 = vmatpush3.bf16.msra.mxu1 %v1697_v6  ;;  %741 = vmatpush1.bf16.msra.mxu0 %v1698_v7  ;;  %v1715_v20 = vld [vmem:[#allocation11 + $0x94] ss:$12 sps:$4 sm:$0xff]   ;;  %v1717_v21 = vld [vmem:[#allocation11 + $0x98] ss:$12 sps:$4 sm:$0xff]   ;;  %v1718_v22 = vld [vmem:[#allocation11 + $0x90] ss:$12 sps:$4 sm:$0xff]   ;;  %v1135_v7 = vlaneseq }
 0x133   : > { %1528 = vmatprep.subr.bf16.mxu1 %v2177_v0  ;;  %742 = vmatprep.subr.bf16.mxu0 %v1699_v8  ;;  %v1719_v23 = vld [vmem:[#allocation11 + $0xac] ss:$12 sps:$4 sm:$0xff]   ;;  %v1721_v24 = vld [vmem:[#allocation11 + $0xb0] ss:$12 sps:$4 sm:$0xff]   ;;  %v1722_v25 = vld [vmem:[#allocation11 + $0xa8] ss:$12 sps:$4 sm:$0xff]  }
 0x134   : > { %v575_v26 = vld [vmem:[%s480_s7] sm:$0xff]  ;;  %v1729_v31 = vld [vmem:[#allocation13 + $0x14] ss:$8 sps:$4 sm:$0xff]   ;;  %v1727_v33 = vld [vmem:[#allocation13 + $0x10] ss:$8 sps:$4 sm:$0xff]   ;;  %v1136_v8 = vshrl.u32 %v1135_v7, 7 }
 0x135   : > { %v1725_v27 = vld [vmem:[#allocation13 + $0x4] ss:$8 sps:$4 sm:$0xff]   ;;  %v577_v29 = vpack.c.bf16 %v575_v26, %v575_v26  ;;  %v1723_v30 = vld [vmem:[#allocation13] ss:$8 sps:$4 sm:$0xff]   ;;  %v1734_v35 = vld [vmem:[#allocation10 + $0x10] sm:$0xff]   ;;  %s2788_s19 = sld [smem:[#allocation33_spill]] }
 0x136   : > { %1529 = vmatpush3.bf16.msra.mxu1 %v1701_v9  ;;  %743 = vmatpush1.bf16.msra.mxu0 %v1702_v10  ;;  %v1726_v28 = vld [vmem:[#allocation10] sm:$0xff]   ;;  %v568_v37 = vld [vmem:[%s2580_s13 + $0x8] sm:$0xff]  ;;  %v1737_v40 = vld [vmem:[#allocation13 + $0x34] ss:$8 sps:$4 sm:$0xff]   ;;  %v1137_v9 = vsub.s32 0, %v1136_v8  ;;  %s1499_s4 = sshll.u32 %s2258_s17, 7 }
 0x137   : > { %1530 = vmatprep.subr.bf16.mxu1 %v2177_v0  ;;  %744 = vmatprep.subr.bf16.mxu0 %v1703_v11  ;;  %v1733_v34 = vld [vmem:[#allocation13 + $0x24] ss:$8 sps:$4 sm:$0xff]   ;;  %v1731_v38 = vld [vmem:[#allocation13 + $0x20] ss:$8 sps:$4 sm:$0xff]   ;;  %v1738_v41 = vld [vmem:[#allocation10 + $0x18] sm:$0xff]   ;;  %s565_s30 = scalar_lea.vmem [#allocation18], %s2594_s1 }
 0x138   : > { %v567_v36 = vld [vmem:[%s2580_s13] sm:$0xff]  ;;  %v1735_v42 = vld [vmem:[#allocation13 + $0x30] ss:$8 sps:$4 sm:$0xff]   ;;  %v1745_v48 = vld [vmem:[#allocation13 + $0x54] ss:$8 sps:$4 sm:$0xff]   ;;  %s1197_s5 = sshll.u32 %s565_s30, 4  ;;  %s2637_s5 = int_to_ptr.vmem [resolvable:$true] %s1197_s5 }
 0x139   : > { %v1503_v39 = vpack.c.bf16 %v568_v37, %v567_v36  ;;  %v1741_v43 = vld [vmem:[#allocation13 + $0x44] ss:$8 sps:$4 sm:$0xff]   ;;  %v819_v45 = vadd.f32 %v568_v37, %v567_v36  ;;  %v1739_v46 = vld [vmem:[#allocation13 + $0x40] ss:$8 sps:$4 sm:$0xff]   ;;  %v569_v47 = vld [vmem:[%s2580_s13 + $0x10] sm:$0xff]  ;;  %s2789_s15 = sld [smem:[#allocation39_spill]] }
 0x13a   : > { %1531 = vmatpush3.bf16.msra.mxu1 %v1705_v12  ;;  %745 = vmatpush1.bf16.msra.mxu0 %v1706_v13  ;;  %v1742_v44 = vld [vmem:[#allocation10 + $0x20] sm:$0xff]   ;;  %v1746_v49 = vld [vmem:[#allocation10 + $0x28] sm:$0xff]   ;;  %v1743_v51 = vld [vmem:[#allocation13 + $0x50] ss:$8 sps:$4 sm:$0xff]   ;;  %s1171_s26 = scalar_lea.sflag [#allocation19], %s2576_s23  ;;  %s2041_s25 = scalar_lea.vmem %s2637_s5, 128 }
 0x13b   : > { %1532 = vmatprep.subr.bf16.mxu1 %v2177_v0  ;;  %746 = vmatprep.subr.bf16.mxu0 %v1707_v14  ;;  %v820_v50 = vadd.f32 %v819_v45, %v569_v47  ;;  %v570_v52 = vld [vmem:[%s2580_s13 + $0x18] sm:$0xff]  ;;  %v1749_v53 = vld [vmem:[#allocation13 + $0x64] ss:$8 sps:$4 sm:$0xff]   ;;  %v1750_v54 = vld [vmem:[#allocation10 + $0x30] sm:$0xff]   ;;  %p2042_p6 = scmp.ne.s32.totalorder %s2637_s5, %s2041_s25  ;;  %p2791_p3 = scmp.ne.s32.totalorder %s2788_s19, 0 }
 0x13c   : > { %v1747_v56 = vld [vmem:[#allocation13 + $0x60] ss:$8 sps:$4 sm:$0xff]   ;;  %v1753_v57 = vld [vmem:[#allocation13 + $0x74] ss:$8 sps:$4 sm:$0xff]   ;;  %v1751_v60 = vld [vmem:[#allocation13 + $0x70] ss:$8 sps:$4 sm:$0xff]   ;;  %v1504_v62 = vpack.c.bf16 %v570_v52, %v569_v47 }
 0x13d   : > { %v821_v55 = vadd.f32 %v820_v50, %v570_v52  ;;  %v1754_v58 = vld [vmem:[#allocation10 + $0x38] sm:$0xff]   ;;  %v1133_v10 = vld [vmem:[#allocation16] sm:$0x3]  ;;  %v1464_v11 = vld [vmem:[#allocation14] ss:$0 sm:$0xff]  ;;  %p2043_p9 = pnand %p2042_p6, %p2791_p3  ;;  %s2180_s20 = smov [#allocation18]  }
 0x13e   : > { %1533 = vmatpush3.bf16.msra.mxu1 %v1709_v15  ;;  %747 = vmatpush1.bf16.msra.mxu0 %v1710_v16  ;;  %v1138_v12 = vrot.slane %v1133_v10, %v1137_v9  ;;  %v572_v50 = vld [vmem:[%s2587_s27 + $0x8] sm:$0xff]  ;;  %s2045_s24 = sshll.u32 %s2180_s20, 4  ;;  %s2046_s24 = int_to_ptr.vmem [resolvable:$false] %s2045_s24 }
 0x13f   : > { %1534 = vmatprep.subr.bf16.mxu1 %v2177_v0  ;;  %748 = vmatprep.subr.bf16.mxu0 %v1711_v17  ;;  %v822_v59 = vmul.f32 0.25, %v821_v55  ;;  %s2790_s11 = smov %s2789_s15  ;;  %s2635_s28 = scalar_lea.hbm %s2789_s15, %s1499_s4 }
 0x140   : > { %p2044_p10 = pneg %p2043_p9  ;;  %s2047_s9 = scalar_lea.vmem %s2046_s24, 256 }
 0x141   : > { %v823_v61 = vpack.c.bf16 %v822_v59, %v822_v59  ;;  %p2048_p2 = scmp.lt.s32.totalorder %s2637_s5, %s2046_s24  ;;  %p2049_p4 = scmp.lt.s32.totalorder %s2047_s9, %s2041_s25 }
 0x142   : > { %1535 = vmatpush3.bf16.msra.mxu1 %v1713_v18  ;;  %749 = vmatpush1.bf16.msra.mxu0 %v1714_v19 }
 0x143   : > { %1536 = vmatprep.subr.bf16.mxu1 %v2177_v0  ;;  %750 = vmatprep.subr.bf16.mxu0 %v1715_v20  ;;  %p2050_p12 = por %p2049_p4, %p2048_p2 }
 0x145   : > { %p2051_p13 = pnand %p2050_p12, %p2044_p10 }
 0x146   : > { %1537 = vmatpush3.bf16.msra.mxu1 %v1717_v21  ;;  %751 = vmatpush1.bf16.msra.mxu0 %v1718_v22 }
 0x147   : > { %1538 = vmatprep.subr.bf16.mxu1 %v2177_v0  ;;  %752 = vmatprep.subr.bf16.mxu0 %v1719_v23 }
 0x14a   : > { %1539 = vmatpush3.bf16.msra.mxu1 %v1721_v24  ;;  %753 = vmatpush1.bf16.msra.mxu0 %v1722_v25 }
 0x14b   : > { %1092 = vmatprep.subr.bf16.mxu1 %v1725_v27  ;;  %1544 = vmatprep.subr.bf16.mxu0 %v1726_v28 }
 0x14d   : > { %1541 = vmatmul.mubr.bf16.vlgmr.msra.gmra.mrb[0].mxu1 %v577_v29  ;;  %771 = vmatmul.mubr.bf16.vlgmr.msra.gmra.mrb[0].mxu0 %v577_v29 }
 0x14e   : > { %1093 = vmatpush1.bf16.msra.mxu1 %v1723_v30  ;;  %1545 = vmatpush3.bf16.msra.mxu0 %v1726_v28 }
 0x14f   : > { %1094 = vmatprep.subr.bf16.mxu1 %v1729_v31  ;;  %1546 = vmatprep.subr.bf16.mxu0 %v1730_v32 }
 0x150   : > { %1124 = vmatprep.mubr.bf16.mxu1 %v2178_v1  ;;  %1560 = vmatprep.mubr.bf16.mxu0 %v1503_v39 }
 0x152   : > { %1095 = vmatpush1.bf16.msra.mxu1 %v1727_v33  ;;  %1547 = vmatpush3.bf16.msra.mxu0 %v1730_v32 }
 0x153   : > { %1096 = vmatprep.subr.bf16.mxu1 %v1733_v34  ;;  %1548 = vmatprep.subr.bf16.mxu0 %v1734_v35  ;;  %v1141_v34 = vsub.s32 1, %v1136_v8 }
 0x156   : > { %1097 = vmatpush1.bf16.msra.mxu1 %v1731_v38  ;;  %1549 = vmatpush3.bf16.msra.mxu0 %v1734_v35  ;;  %v1142_v35 = vrot.slane %v1133_v10, %v1141_v34 }
 0x157   : > { %1098 = vmatprep.subr.bf16.mxu1 %v1737_v40  ;;  %1550 = vmatprep.subr.bf16.mxu0 %v1738_v41 }
 0x15a   : > { %1099 = vmatpush1.bf16.msra.mxu1 %v1735_v42  ;;  %1551 = vmatpush3.bf16.msra.mxu0 %v1738_v41 }
 0x15b   : > { %1100 = vmatprep.subr.bf16.mxu1 %v1741_v43  ;;  %1552 = vmatprep.subr.bf16.mxu0 %v1742_v44 }
 0x15e   : > { %1101 = vmatpush1.bf16.msra.mxu1 %v1739_v46  ;;  %1553 = vmatpush3.bf16.msra.mxu0 %v1742_v44 }
 0x15f   : > { %1102 = vmatprep.subr.bf16.mxu1 %v1745_v48  ;;  %1554 = vmatprep.subr.bf16.mxu0 %v1746_v49 }
 0x162   : > { %1103 = vmatpush1.bf16.msra.mxu1 %v1743_v51  ;;  %1555 = vmatpush3.bf16.msra.mxu0 %v1746_v49  ;;  %v571_v49 = vld [vmem:[%s2587_s27] sm:$0xff] }
 0x163   : > { %1104 = vmatprep.subr.bf16.mxu1 %v1749_v53  ;;  %1556 = vmatprep.subr.bf16.mxu0 %v1750_v54  ;;  %v573_v53 = vld [vmem:[%s2587_s27 + $0x10] sm:$0xff] }
 0x166   : > { %1105 = vmatpush1.bf16.msra.mxu1 %v1747_v56  ;;  %1557 = vmatpush3.bf16.msra.mxu0 %v1750_v54 }
 0x167   : > { %1106 = vmatprep.subr.bf16.mxu1 %v1753_v57  ;;  %1558 = vmatprep.subr.bf16.mxu0 %v1754_v58  ;;  %v574_v57 = vld [vmem:[%s2587_s27 + $0x18] sm:$0xff] }
 0x16a   : > { %1107 = vmatpush1.bf16.msra.mxu1 %v1751_v60  ;;  %1559 = vmatpush3.bf16.msra.mxu0 %v1754_v58 }
 0x16d   : > { %1125 = vmatmul.mubr.bf16.vlgmr.msra.gmra.mrb[4].mxu1 %v823_v61  ;;  %1561 = vmatmul.mubr.bf16.vlgmr.msra.gmra.mrb[4].mxu0 %v1504_v62  ;;  %v576_v62 = vld [vmem:[%s489_s18] sm:$0xff] }
 0x220   : > { %v813_v63 = vpop.f32.mrb[0].mxu1  ;;  %v772_v0 = vpop.f32.mrb[0].mxu0 }
 0x221   : > { %v1542_v1 = vpop.f32.mrb[1].mxu1  ;;  %v774_v2 = vpop.f32.mrb[1].mxu0  ;;  %v847_v13 = vadd.f32 %v1464_v11, %v772_v0 }
 0x222   : > { %v816_v3 = vpop.f32.mrb[2].mxu1  ;;  %v776_v4 = vpop.f32.mrb[2].mxu0 }
 0x223   : > { %v1543_v5 = vpop.f32.mrb[3].mxu1  ;;  %v777_v6 = vpop.f32.mrb[3].mxu0 }
 0x240   : > { %v1126_v14 = vpop.f32.mrb[4].mxu1  ;;  %v1562_v16 = vpop.f32.mrb[4].mxu0 }
 0x241   : > { %v1127_v15 = vadd.f32 %v1126_v14, %v774_v2  ;;  %v1128_v17 = vpop.f32.mrb[5].mxu1  ;;  %v979_v18 = vadd.f32 %v1562_v16, %v847_v13  ;;  %v962_v20 = vpop.f32.mrb[5].mxu0 }
 0x242   : > { %v1129_v19 = vadd.f32 %v1128_v17, %v813_v63  ;;  %v1130_v21 = vpop.f32.mrb[6].mxu1  ;;  %v977_v23 = vadd.f32 %v962_v20, %v847_v13  ;;  %v1563_v24 = vpop.f32.mrb[6].mxu0 }
 0x243   : > { %v1145_v22 = vadd.f32 %v1138_v12, %v1127_v15  ;;  %v1131_v25 = vpop.f32.mrb[7].mxu1  ;;  %v1477_v26 = vmul.f32 -1.442695, %v979_v18  ;;  %v980_v27 = vadd.f32 %v1563_v24, %v847_v13  ;;  %v965_v28 = vpop.f32.mrb[7].mxu0 }
 0x244   : > { %v1475_v30 = vmul.f32 -1.442695, %v977_v23  ;;  %v978_v31 = vadd.f32 %v965_v28, %v847_v13  ;;  %v1146_v40 = vadd.f32 %v1142_v35, %v1129_v19 }
 0x245   : > { %v1495_v29 = vmul.f32 -1.442695, %v1145_v22  ;;  %1755 = vpow2.f32 %v1477_v26  ;;  %v1478_v32 = vmul.f32 -1.442695, %v980_v27 }
 0x246   : > { %v1476_v33 = vmul.f32 -1.442695, %v978_v31  ;;  %v1496_v46 = vmul.f32 -1.442695, %v1146_v40 }
 0x247   : > { %1757 = vpow2.f32 %v1495_v29 }
 0x248   : > { %1759 = vpow2.f32 %v1475_v30 }
 0x249   : > { %1761 = vpow2.f32 %v1478_v32 }
 0x24a   : > { %1763 = vpow2.f32 %v1476_v33 }
 0x24f   : > { %v1756_v36 = vpop.eup %1755 }
 0x250   : > { %v995_v39 = vadd.f32 1.0, %v1756_v36 }
 0x251   : > { %v1758_v37 = vpop.eup %1757 }
 0x252   : > { %v1760_v38 = vpop.eup %1759  ;;  %v1153_v47 = vadd.f32 1.0, %v1758_v37 }
 0x253   : > { %v1762_v41 = vpop.eup %1761  ;;  %v993_v42 = vadd.f32 1.0, %v1760_v38 }
 0x254   : > { %v1764_v43 = vpop.eup %1763  ;;  %v996_v44 = vadd.f32 1.0, %v1762_v41 }
 0x255   : > { %1765 = vrcp.f32 %v993_v42  ;;  %v994_v45 = vadd.f32 1.0, %v1764_v43 }
 0x256   : > { %1767 = vrcp.f32 %v995_v39 }
 0x257   : > { %1769 = vrcp.f32 %v994_v45 }
 0x258   : > { %1771 = vrcp.f32 %v996_v44 }
 0x259   : > { %1773 = vpow2.f32 %v1496_v46 }
 0x25a   : > { %1775 = vrcp.f32 %v1153_v47 }
 0x25f   : > { %v1766_v48 = vpop.eup %1765 }
 0x260   : > { %v1768_v51 = vpop.eup %1767  ;;  %v1005_v54 = vmul.f32 %v1766_v48, %v571_v49 }
 0x261   : > { %v1770_v52 = vpop.eup %1769  ;;  %v1007_v59 = vmul.f32 %v1768_v51, %v573_v53 }
 0x262   : > { %v1006_v55 = vmul.f32 %v1770_v52, %v572_v50  ;;  %v1772_v56 = vpop.eup %1771 }
 0x263   : > { %v1774_v58 = vpop.eup %1773  ;;  %v1008_v63 = vmul.f32 %v1772_v56, %v574_v57 }
 0x264   : > { %v1009_v60 = vadd.f32 %v1006_v55, %v1005_v54  ;;  %v1776_v61 = vpop.eup %1775  ;;  %v1154_v1 = vadd.f32 1.0, %v1774_v58 }
 0x265   : > { %v1159_v2 = vmul.f32 %v1776_v61, %v576_v62 }
 0x266   : > { %v1010_v0 = vadd.f32 %v1009_v60, %v1007_v59  ;;  %1777 = vrcp.f32 %v1154_v1 }
 0x268   : > { %v1011_v3 = vadd.f32 %v1010_v0, %v1008_v63 }
 0x26a   : > { %v1160_v4 = vadd.f32 %v1159_v2, %v1011_v3 }
 0x26c   : > { %1779 = vtanh.f32 %v1160_v4  ;;  %1161 = vst [vmem:[%s565_s30] sm:$0xff] %v1160_v4 }
 0x26d   : > { %2054 = shalt.err (!%p2051_p13)
}
 0x26e   : > { %s2055_s13 = scalar_lea.hbm %s2635_s28, 128  ;;  %s2059_s27 = scalar_lea.hbm %s2790_s11, 256 }
 0x26f   : > { %p2056_p7 = scmp.ne.s32.totalorder %s2635_s28, %s2055_s13  ;;  %p2060_p11 = scmp.lt.u32.totalorder %s2635_s28, %s2790_s11 }
 0x270   : > { %p2061_p5 = scmp.lt.u32.totalorder %s2059_s27, %s2055_s13  ;;  %p2063_p6 = scmp.lt.u32.totalorder %s2055_s13, %s2635_s28 }
 0x271   : > { %p2057_p8 = pnand %p2056_p7, %p2791_p3 }
 0x272   : > { %p2062_p1 = por %p2061_p5, %p2060_p11 }
 0x273   : > { %p2058_p0 = pneg %p2057_p8 }
 0x274   : > { %p2064_p9 = por %p2063_p6, %p2062_p1 }
 0x276   : > { %p2065_p10 = pnand %p2064_p9, %p2058_p0 }
 0x278   : > { %2068 = shalt.err (!%p2065_p10)
}
 0x279   : > { %1593 = dma.vmem_to_hbm [thread:$0]  (%p2791_p3), %s2637_s5, 128, %s2635_s28, %s1171_s26   ;;  %v1778_v5 = vpop.eup %1777 }
 0x27a   : > { %s558_s18 = scalar_lea.vmem [#allocation17], %s2594_s1  ;;  %v1780_v6 = vpop.eup %1779  ;;  %s2792_s15 = sld [smem:[#allocation38_spill]] }
 0x27b   : > { %s1184_s30 = sshll.u32 %s558_s18, 4  ;;  %v1163_v7 = vmul.f32 %v1780_v6, %v1778_v5  ;;  %s1166_s24 = scalar_lea.sflag [#allocation4], %s2576_s23  ;;  %s2669_s30 = int_to_ptr.vmem [resolvable:$true] %s1184_s30 }
 0x27c   : > { %s2069_s9 = scalar_lea.vmem %s2669_s30, 128  ;;  %s2181_s1 = smov [#allocation17]  }
 0x27d   : > { %1164 = vst [vmem:[%s558_s18] sm:$0xff] %v1163_v7  ;;  %p2070_p2 = scmp.ne.s32.totalorder %s2669_s30, %s2069_s9  ;;  %s2073_s5 = sshll.u32 %s2181_s1, 4  ;;  %s2074_s5 = int_to_ptr.vmem [resolvable:$false] %s2073_s5 }
 0x27e   : > { %s2075_s17 = scalar_lea.vmem %s2074_s5, 256  ;;  %p2076_p13 = scmp.lt.s32.totalorder %s2669_s30, %s2074_s5 }
 0x27f   : > { %p2071_p4 = pnand %p2070_p2, %p2791_p3  ;;  %p2077_p7 = scmp.lt.s32.totalorder %s2075_s17, %s2069_s9 }
 0x280   : > { %s2793_s25 = smov %s2792_s15  ;;  %s2667_s20 = scalar_lea.hbm %s2792_s15, %s1499_s4 }
 0x281   : > { %p2072_p12 = pneg %p2071_p4  ;;  %p2078_p8 = por %p2077_p7, %p2076_p13 }
 0x283   : > { %p2079_p0 = pnand %p2078_p8, %p2072_p12 }
 0x285   : > { %2082 = shalt.err (!%p2079_p0)
}
 0x286   : > { %s2083_s23 = scalar_lea.hbm %s2667_s20, 128  ;;  %s2087_s26 = scalar_lea.hbm %s2793_s25, 256 }
 0x287   : > { %p2084_p11 = scmp.ne.s32.totalorder %s2667_s20, %s2083_s23  ;;  %p2088_p6 = scmp.lt.u32.totalorder %s2667_s20, %s2793_s25 }
 0x288   : > { %p2089_p9 = scmp.lt.u32.totalorder %s2087_s26, %s2083_s23  ;;  %p2091_p2 = scmp.lt.u32.totalorder %s2083_s23, %s2667_s20 }
 0x289   : > { %p2085_p5 = pnand %p2084_p11, %p2791_p3 }
 0x28a   : > { %p2090_p10 = por %p2089_p9, %p2088_p6 }
 0x28b   : > { %p2086_p1 = pneg %p2085_p5 }
 0x28c   : > { %p2092_p4 = por %p2091_p2, %p2090_p10 }
 0x28e   : > { %p2093_p12 = pnand %p2092_p4, %p2086_p1 }
 0x290   : > { %2096 = shalt.err (!%p2093_p12)
}
 0x291   : > { %1592 = dma.vmem_to_hbm [thread:$0]  (%p2791_p3), %s2669_s30, 128, %s2667_s20, %s1166_s24  }
 0x292 PF: > { %s2794_s21 = sld [smem:[#allocation28_spill]]  ;;  %s2795_s27 = sld [smem:[#allocation30_spill]] }
 0x293   : > { %p2797_p7 = scmp.ge.s32.totalorder %s2159_s16, 2 }
 0x298   : > { %s1209_s7 = sand.u32 1, %s2794_s21   ;;  %p2796_p13 = scmp.ne.s32.totalorder %s2795_s27, 0 }
 0x299   : > { %s1210_s12 = scalar_lea.sflag [#allocation4], %s1209_s7 }
 0x29a   : > { %p1626_p8 = pnand %p2797_p7, %p2796_p13 }
 0x29c   : > { %2138 = dma.done.wait (!%p1626_p8), %s1210_s12, 128  }
 0x29d   : > { %2140 = vsyncadd (!%p1626_p8), %s1210_s12, 4294967168  ;;  %s1219_s18 = scalar_lea.sflag [#allocation19], %s1209_s7 }
 0x29e   : > { %2142 = dma.done.wait (!%p1626_p8), %s1219_s18, 128  }
 0x29f   : > { %2144 = vsyncadd (!%p1626_p8), %s1219_s18, 4294967168  ;;  %s2798_s16 = sld [smem:[#allocation31_spill]]  ;;  %s2799_s19 = sld [smem:[#allocation29_spill]] }
 0x2a0   : > { %s2800_s15 = sld [smem:[#allocation32_spill]]  ;;  %s2801_s13 = smov %s2151_s14 }
 0x2a5   : > { %p35_p3 = scmp.ge.s32.totalorder %s2798_s16, 4   ;;  %s2802_s14 = smov %s2799_s19 }
 0x2a7   :  { %37 = sbr.rel (!%p35_p3) target bundleno = 20 (0x14), region = 175 }
 0x2ae   :  { %1224 = vsyncpa [#allocation3], 1 }
 0x2af   :  { %1226 = vsyncpa [#allocation3 + $0x1], 1 }
 0x2b0   :  { %1227 = vsyncpa [#allocation6], 1 }
 0x2b1   :  { %1229 = vsyncpa [#allocation6 + $0x1], 1 }
 0x2b2   :  { %1230 = vsyncpa [#allocation9], 1 }
 0x2b3   :  { %1232 = vsyncpa [#allocation9 + $0x1], 1 }
 0x2b4   :  { %1233 = vsyncpa [#allocation12], 1 }
 0x2b5   :  { %1234 = vsyncpa [#allocation15], 1 }
 0x2b6   :  { %1235 = vsyncpa [#allocation4], 1 }
 0x2b7   :  { %1237 = vsyncpa [#allocation4 + $0x1], 1 }
 0x2b8   :  { %1238 = vsyncpa [#allocation19], 1 }
 0x2b9   :  { %1240 = vsyncpa [#allocation19 + $0x1], 1 }

</bundles_post_ra>
